<compile_context>
chip_gen: v7x
topology: tpu7x:2x2x1
jax: 0.10.0
libtpu: 0.0.40
codegen_flags: <defaults>
</compile_context>

<pallas_src>
import jax
import jax.numpy as jnp
from jax.experimental import pallas as pl
from jax.experimental.pallas import tpu as pltpu


_LANE_CANDIDATES = (8192, 4096, 2048, 1024, 512, 256, 128)
_BLOCK_BYTES = 2 * 1024 * 1024  # ~2 MiB/block; ~4x resident when double-buffered.


def _copy_kernel(x_ref, o_ref):
    # Identity copy of the current block (the only memory-movement hot path).
    o_ref[...] = x_ref[...]


def _round_down(v, m):
    return (v // m) * m


def _pick_slab_width(total):
    """Widest lane count (multiple of 128) dividing `total`, preferring >=8 rows."""
    fallback = None
    for c in _LANE_CANDIDATES:
        if total % c == 0:
            if fallback is None:
                fallback = c
            if total // c >= 8:
                return c
    return fallback  # None if total is not a multiple of 128.


def _tiled_copy_2d(arr, *, block_bytes=_BLOCK_BYTES):
    """Materializing identity copy of a 2-D array via a tiled Pallas kernel."""
    rows, cols = arr.shape
    item = arr.dtype.itemsize

    # Lane (last-dim) block: full width if it fits comfortably, otherwise a
    # large multiple of 128 (tail handled by cdiv + Pallas masking).
    if cols * 8 * item <= block_bytes:
        bc = cols
    else:
        bc = max(128, _round_down(block_bytes // (8 * item), 128))
        bc = min(bc, _round_down(cols, 128))

    # Sublane (second-to-last) block: full height if it fits, else a multiple
    # of 8 sized to keep the block within the byte budget.
    rows_fit = max(1, block_bytes // (bc * item))
    if rows <= rows_fit:
        br = rows
    else:
        br = max(8, _round_down(rows_fit, 8))

    grid = (pl.cdiv(rows, br), pl.cdiv(cols, bc))

    return pl.pallas_call(
        _copy_kernel,
        out_shape=jax.ShapeDtypeStruct((rows, cols), arr.dtype),
        grid=grid,
        in_specs=[pl.BlockSpec((br, bc), lambda i, j: (i, j))],
        out_specs=pl.BlockSpec((br, bc), lambda i, j: (i, j)),
        compiler_params=pltpu.CompilerParams(
            dimension_semantics=("parallel", "parallel"),
        ),
        cost_estimate=pl.CostEstimate(
            flops=0,
            transcendentals=0,
            bytes_accessed=2 * rows * cols * item,
        ),
    )(arr)


def flatten(x: jax.Array, *, materialize: bool = True) -> jax.Array:
    """Pallas equivalent of torch `x.view(x.size(0), -1)`."""
    n = x.shape[0]
    f = 1
    for d in x.shape[1:]:
        f *= d

    if not materialize:
        # Recommended production path: flatten is pure metadata (free reshape).
        return x.reshape(n, f)

    total = n * f
    slab_w = _pick_slab_width(total)
    if slab_w is not None:
        # Lane/sublane-dense slab copy, then metadata reshape back to (N, F).
        slab = x.reshape(total // slab_w, slab_w)
        return _tiled_copy_2d(slab).reshape(n, f)

    # Irregular sizes (total not a multiple of 128): copy (N, F) directly with
    # cdiv-tiled blocks (partial tail blocks are masked by Pallas).
    return _tiled_copy_2d(x.reshape(n, f))


if __name__ == "__main__":
    key = jax.random.PRNGKey(0)
    # Small NCHW input consistent with a conv-feature flatten: (2, 4, 16, 16).
    x = jax.random.normal(key, (2, 4, 16, 16), dtype=jnp.float32)

    y = jax.block_until_ready(flatten(x))

    # Reference check against plain JAX (same semantics as torch .view(N, -1)).
    y_ref = x.reshape(x.shape[0], -1)
    assert y.shape == (2, 4 * 16 * 16), y.shape
    assert y.dtype == x.dtype
    assert bool(jnp.array_equal(y, y_ref))

    print("KERNEL_OK")
</pallas_src>

<mosaic_0001>
module attributes {stable_mosaic.version = 11 : i64} {
  func.func @_copy_kernel(%arg0: i32, %arg1: i32, %arg2: memref<8x256xf32, #tpu.memory_space<vmem>>, %arg3: memref<8x256xf32, #tpu.memory_space<vmem>>) attributes {dimension_semantics = [#tpu.dimension_semantics<parallel>, #tpu.dimension_semantics<parallel>], iteration_bounds = array<i64: 1, 1>, scalar_prefetch = 0 : i64, scratch_operands = 0 : i64, tpu.core_type = #tpu.core_type<tc>, window_params = [{transform_indices = @transform_0, window_bounds = array<i64: 8, 256>}, {transform_indices = @transform_1, window_bounds = array<i64: 8, 256>}]} {
    %c0 = arith.constant 0 : index
    %c0_0 = arith.constant 0 : index
    %0 = vector.load %arg2[%c0, %c0_0] : memref<8x256xf32, #tpu.memory_space<vmem>>, vector<8x256xf32>
    %c0_1 = arith.constant 0 : index
    %c0_2 = arith.constant 0 : index
    %1 = vector.load %arg3[%c0_1, %c0_2] : memref<8x256xf32, #tpu.memory_space<vmem>>, vector<8x256xf32>
    tpu.vector_store %arg3[%c0_1, %c0_2], %0 {strides = array<i32>} : memref<8x256xf32, #tpu.memory_space<vmem>>, vector<8x256xf32>,
    return
  }
  func.func @transform_0(%arg0: i32, %arg1: i32) -> (i32, i32) {
    %c0_i32 = arith.constant 0 : i32
    return %arg0, %arg1 : i32, i32
  }
  func.func @transform_1(%arg0: i32, %arg1: i32) -> (i32, i32) {
    %c0_i32 = arith.constant 0 : i32
    return %arg0, %arg1 : i32, i32
  }
}

</mosaic_0001>

<bundles_post_ra>
// kernel: tpu_custom_call.1
= control target key start
LH: loop header
LB: loop body
LE: loop exit
PB: predicated region body
PF: predicated region fallthrough
CT: control target
= control target key end

     0   :  { %6 = vsyncpa [#allocation3], 0  ;;  %s126_s0 = inlined_call_operand.hbm [shape: f32[8,256], index: 0, kind: input, shape index: {}]   ;;  %s127_s1 = inlined_call_operand.hbm [shape: f32[8,256], index: 1, kind: output, shape index: {}]  }
   0x1   :  { %7 = vsyncpa [#allocation4], 0  ;;  %s90_s6 = smov [#allocation2]   ;;  %s42_s10 = scalar_lea.hbm %s126_s0, 256 }
   0x2   :  { %s14_s7 = sshll.u32 %s90_s6, 4  ;;  %p43_p0 = scmp.ne.s32.totalorder %s126_s0, %s42_s10  ;;  %s15_s7 = int_to_ptr.vmem [resolvable:$true] %s14_s7 }
   0x3   :  { %p46_p1 = scmp.lt.u32.totalorder %s42_s10, %s126_s0 }
   0x5   :  { %p48_p2 = pnand %p46_p1, %p43_p0 }
   0x7   :  { %51 = shalt.err (!%p48_p2)
}
   0x8   :  { %s52_s15 = scalar_lea.vmem %s15_s7, 256  ;;  %p57_p4 = scmp.lt.s32.totalorder %s15_s7, %s15_s7 }
   0x9   :  { %p53_p3 = scmp.ne.s32.totalorder %s15_s7, %s52_s15  ;;  %p58_p5 = scmp.lt.s32.totalorder %s52_s15, %s52_s15 }
   0xb   :  { %p59_p6 = por %p58_p5, %p57_p4 }
   0xd   :  { %p60_p7 = pnand %p59_p6, %p53_p3 }
   0xf   :  { %63 = shalt.err (!%p60_p7)
}
  0x10   :  { %17 = dma.hbm_to_vmem [thread:$0]  %s126_s0, 256, %s15_s7, [#allocation3]  }
  0x11   :  { %86 = dma.done.wait [#allocation3], 256  }
  0x12   :  { %87 = vsyncadd [#allocation3], 4294967040  ;;  %s91_s18 = smov [#allocation5]   ;;  %v21_v0 = vld [vmem:[#allocation2] sm:$0xff]  ;;  %v22_v1 = vld [vmem:[#allocation2 + $0x8] sm:$0xff] }
  0x13   :  { %s31_s19 = sshll.u32 %s91_s18, 4  ;;  %23 = vst [vmem:[#allocation5] sm:$0xff] %v21_v0  ;;  %24 = vst [vmem:[#allocation5 + $0x8] sm:$0xff] %v22_v1  ;;  %s32_s19 = int_to_ptr.vmem [resolvable:$true] %s31_s19 }
  0x14   :  { %s64_s20 = scalar_lea.vmem %s32_s19, 256  ;;  %p69_p9 = scmp.lt.s32.totalorder %s32_s19, %s32_s19 }
  0x15   :  { %p65_p8 = scmp.ne.s32.totalorder %s32_s19, %s64_s20  ;;  %p70_p10 = scmp.lt.s32.totalorder %s64_s20, %s64_s20 }
  0x17   :  { %p71_p11 = por %p70_p10, %p69_p9 }
  0x19   :  { %p72_p12 = pnand %p71_p11, %p65_p8 }
  0x1b   :  { %75 = shalt.err (!%p72_p12)
}
  0x1c   :  { %s76_s0 = scalar_lea.hbm %s127_s1, 256 }
  0x1d   :  { %p77_p13 = scmp.ne.s32.totalorder %s127_s1, %s76_s0  ;;  %p80_p0 = scmp.lt.u32.totalorder %s76_s0, %s127_s1 }
  0x1f   :  { %p82_p1 = pnand %p80_p0, %p77_p13 }
  0x21   :  { %85 = shalt.err (!%p82_p1)
}
  0x22   :  { %34 = dma.vmem_to_hbm [thread:$0]  %s32_s19, 256, %s127_s1, [#allocation4]  }
  0x23   :  { %88 = dma.done.wait [#allocation4], 256  }
  0x24   :  { %89 = vsyncadd [#allocation4], 4294967040 }
  0x25   :  { %38 = vsyncpa [#allocation3], 1 }
  0x26   :  { %39 = vsyncpa [#allocation4], 1 }

</bundles_post_ra>
